<compile_context>
chip_gen: v5e
topology: v5e:2x2
jax: 0.10.0
libtpu: 0.0.40
codegen_flags: <defaults>
</compile_context>

<pallas_src>
import jax
import jax.numpy as jnp
from jax.experimental import pallas as pl
from jax.experimental.pallas import tpu as pltpu

EPS = 1e-5
NEG_SLOPE = 0.01
LANES = 128

# logical layer dims (in, out) and batchnorm widths of the PyTorch module
_LIN_DIMS = [(78, 78), (78, 36), (36, 36), (36, 36), (36, 36), (36, 1)]
_BN_DIMS = [78, 78, 36, 36, 36]

# vector-slab row layout: rows 0..4 gammas, 5..9 betas, 10..15 linear biases
_G_ROW = 0
_BE_ROW = 5
_B_ROW = 10
_VEC_ROWS = 16


def _mlp_kernel(x_ref, w_ref, v_ref, o_ref):
    inv_n = 1.0 / x_ref.shape[0]

    def batchnorm(h, layer):
        g = v_ref[_G_ROW + layer:_G_ROW + layer + 1, :]       # (1, 128)
        be = v_ref[_BE_ROW + layer:_BE_ROW + layer + 1, :]    # (1, 128)
        # single-pass stats: sum(h) and sum(h*h) are independent XLU reductions
        s1 = jnp.sum(h, axis=0, keepdims=True)
        s2 = jnp.sum(h * h, axis=0, keepdims=True)
        mu = s1 * inv_n
        var = s2 * inv_n - mu * mu                             # biased variance
        # fold gamma/rsqrt/mu/beta into one per-column affine (computed on a
        # single (1,128) row), then apply 2 VALU ops per activation element.
        scale = g * jax.lax.rsqrt(var + EPS)                   # (1, 128)
        shift = be - mu * scale                                # (1, 128)
        return h * scale + shift

    def linear(h, layer):
        w = w_ref[layer]                                       # (128, 128)
        b = v_ref[_B_ROW + layer:_B_ROW + layer + 1, :]        # (1, 128)
        return jnp.dot(h, w, preferred_element_type=jnp.float32) + b

    def leaky_relu(h):
        # for 0 < slope < 1: max(h, slope*h) == LeakyReLU(h); avoids cmp+select
        return jnp.maximum(h, NEG_SLOPE * h)

    h = x_ref[...]                        # already f32, no dead cast
    for layer in range(5):                # 78->78, 78->36, 36->36, 36->36, 36->36
        h = leaky_relu(linear(batchnorm(h, layer), layer))
    # final linear (36 -> 1), stored lane-dense: column 0 holds the prediction,
    # columns 1..127 are exactly zero (zero-padded weight cols / zero bias pad).
    o_ref[...] = linear(h, 5)


def _full_spec(shape):
    # Whole-array block (everything is tiny and fits VMEM; no grid needed).
    return pl.BlockSpec(shape, lambda: tuple(0 for _ in shape))


def pack_params(params):
    """Pack the 22 logical parameters into 2 lane-padded slabs (done once)."""
    (g0, be0, w0, b0, g1, be1, w1, b1, g2, be2, w2, b2,
     g3, be3, w3, b3, g4, be4, w4, b4, w5, b5) = params
    gammas = [g0, g1, g2, g3, g4]
    betas = [be0, be1, be2, be3, be4]
    ws = [w0, w1, w2, w3, w4, w5]
    bs = [b0, b1, b2, b3, b4, b5]

    w_slab = jnp.zeros((6, LANES, LANES), jnp.float32)
    for i, w in enumerate(ws):
        w_slab = w_slab.at[i, :w.shape[0], :w.shape[1]].set(w)

    v_slab = jnp.zeros((_VEC_ROWS, LANES), jnp.float32)
    for i, g in enumerate(gammas):
        v_slab = v_slab.at[_G_ROW + i, :g.shape[1]].set(g[0])
    for i, be in enumerate(betas):         # padded beta entries stay 0
        v_slab = v_slab.at[_BE_ROW + i, :be.shape[1]].set(be[0])
    for i, b in enumerate(bs):             # padded bias entries stay 0
        v_slab = v_slab.at[_B_ROW + i, :b.shape[1]].set(b[0])
    return w_slab, v_slab


def mlp_forward(x, w_slab, v_slab):
    n, f_in = x.shape
    x_pad = jnp.zeros((n, LANES), jnp.float32).at[:, :f_in].set(x)

    y_pad = pl.pallas_call(
        _mlp_kernel,
        out_shape=jax.ShapeDtypeStruct((n, LANES), jnp.float32),
        in_specs=[_full_spec(x_pad.shape),
                  _full_spec(w_slab.shape),
                  _full_spec(v_slab.shape)],
        out_specs=_full_spec((n, LANES)),
        compiler_params=pltpu.CompilerParams(
            vmem_limit_bytes=32 * 1024 * 1024),  # explicit, fits v5e/v6e/v7x
    )(x_pad, w_slab, v_slab)
    return y_pad[:, :1]


def init_params(key):
    """Deterministic init mimicking PyTorch defaults:
    Linear: W,b ~ U(-1/sqrt(fan_in), 1/sqrt(fan_in)); BatchNorm: gamma=1, beta=0."""
    params = []
    keys = jax.random.split(key, 2 * len(_LIN_DIMS))
    lin = []
    for i, (fin, fout) in enumerate(_LIN_DIMS):
        k = 1.0 / jnp.sqrt(jnp.float32(fin))
        w = jax.random.uniform(keys[2 * i], (fin, fout), jnp.float32, -k, k)  # (in, out)
        b = jax.random.uniform(keys[2 * i + 1], (1, fout), jnp.float32, -k, k)
        lin.append((w, b))

    for i in range(5):
        c = _BN_DIMS[i]
        gamma = jnp.ones((1, c), jnp.float32)
        beta = jnp.zeros((1, c), jnp.float32)
        w, b = lin[i]
        params.extend([gamma, beta, w, b])
    params.extend(list(lin[5]))            # final output linear (no batchnorm)
    return params


def reference_forward(x, params):
    """Pure-JAX reference (classic two-pass BN) for the correctness check."""
    def bn(h, g, b):
        mu = jnp.mean(h, axis=0, keepdims=True)
        var = jnp.mean((h - mu) ** 2, axis=0, keepdims=True)
        return (h - mu) / jnp.sqrt(var + EPS) * g + b

    def lrelu(h):
        return jnp.where(h > 0, h, NEG_SLOPE * h)

    (g0, be0, w0, b0, g1, be1, w1, b1, g2, be2, w2, b2,
     g3, be3, w3, b3, g4, be4, w4, b4, w5, b5) = params
    h = x
    h = lrelu(bn(h, g0, be0) @ w0 + b0)
    h = lrelu(bn(h, g1, be1) @ w1 + b1)
    h = lrelu(bn(h, g2, be2) @ w2 + b2)
    h = lrelu(bn(h, g3, be3) @ w3 + b3)
    h = lrelu(bn(h, g4, be4) @ w4 + b4)
    return h @ w5 + b5


if __name__ == "__main__":
    key = jax.random.PRNGKey(0)
    kx, kp = jax.random.split(key)

    N = 8  # small batch (>1 required for meaningful training-mode batchnorm)
    x = jax.random.normal(kx, (N, 78), dtype=jnp.float32)
    params = init_params(kp)

    # pack once, reuse across calls (launch cost amortization happens at the
    # call site; per-call work is just the x padding + one pallas_call)
    w_slab, v_slab = pack_params(params)

    y = mlp_forward(x, w_slab, v_slab)
    y = jax.block_until_ready(y)

    y_ref = reference_forward(x, params)
    assert y.shape == (N, 1)
    assert jnp.allclose(y, y_ref, atol=1e-4, rtol=1e-4), (y, y_ref)

    print("KERNEL_OK")
</pallas_src>

<mosaic_0001>
module attributes {stable_mosaic.version = 11 : i64} {
  func.func @_mlp_kernel(%arg0: memref<8x128xf32, #tpu.memory_space<vmem>>, %arg1: memref<6x128x128xf32, #tpu.memory_space<vmem>>, %arg2: memref<16x128xf32, #tpu.memory_space<vmem>>, %arg3: memref<8x128xf32, #tpu.memory_space<vmem>>) attributes {dimension_semantics = [], scalar_prefetch = 0 : i64, scratch_operands = 0 : i64, tpu.core_type = #tpu.core_type<tc>} {
    %c0 = arith.constant 0 : index
    %c0_0 = arith.constant 0 : index
    %0 = vector.load %arg0[%c0, %c0_0] : memref<8x128xf32, #tpu.memory_space<vmem>>, vector<8x128xf32>
    %c0_1 = arith.constant 0 : index
    %c0_2 = arith.constant 0 : index
    %1 = vector.load %arg2[%c0_1, %c0_2] : memref<16x128xf32, #tpu.memory_space<vmem>>, vector<1x128xf32>
    %c5 = arith.constant 5 : index
    %c0_3 = arith.constant 0 : index
    %2 = vector.load %arg2[%c5, %c0_3] : memref<16x128xf32, #tpu.memory_space<vmem>>, vector<1x128xf32>
    %cst = arith.constant dense<0.000000e+00> : vector<128xf32>
    %3 = vector.multi_reduction <add>, %0, %cst [0] : vector<8x128xf32> to vector<128xf32>
    %4 = vector.shape_cast %3 : vector<128xf32> to vector<1x128xf32>
    %5 = arith.mulf %0, %0 : vector<8x128xf32>
    %cst_4 = arith.constant dense<0.000000e+00> : vector<128xf32>
    %6 = vector.multi_reduction <add>, %5, %cst_4 [0] : vector<8x128xf32> to vector<128xf32>
    %7 = vector.shape_cast %6 : vector<128xf32> to vector<1x128xf32>
    %cst_5 = arith.constant 1.250000e-01 : f32
    %8 = vector.broadcast %cst_5 : f32 to vector<1x128xf32>
    %9 = arith.mulf %4, %8 : vector<1x128xf32>
    %cst_6 = arith.constant 1.250000e-01 : f32
    %10 = vector.broadcast %cst_6 : f32 to vector<1x128xf32>
    %11 = arith.mulf %7, %10 : vector<1x128xf32>
    %12 = arith.mulf %9, %9 : vector<1x128xf32>
    %13 = arith.subf %11, %12 : vector<1x128xf32>
    %cst_7 = arith.constant 9.99999974E-6 : f32
    %14 = vector.broadcast %cst_7 : f32 to vector<1x128xf32>
    %15 = arith.addf %13, %14 : vector<1x128xf32>
    %16 = math.rsqrt %15 : vector<1x128xf32>
    %17 = arith.mulf %1, %16 : vector<1x128xf32>
    %18 = arith.mulf %9, %17 : vector<1x128xf32>
    %19 = arith.subf %2, %18 : vector<1x128xf32>
    %20 = vector.broadcast %17 : vector<1x128xf32> to vector<8x128xf32>
    %21 = arith.mulf %0, %20 : vector<8x128xf32>
    %22 = vector.broadcast %19 : vector<1x128xf32> to vector<8x128xf32>
    %23 = arith.addf %21, %22 : vector<8x128xf32>
    %c0_8 = arith.constant 0 : index
    %c0_9 = arith.constant 0 : index
    %c0_10 = arith.constant 0 : index
    %24 = vector.load %arg1[%c0_8, %c0_9, %c0_10] : memref<6x128x128xf32, #tpu.memory_space<vmem>>, vector<1x128x128xf32>
    %25 = vector.shape_cast %24 : vector<1x128x128xf32> to vector<128x128xf32>
    %c10 = arith.constant 10 : index
    %c0_11 = arith.constant 0 : index
    %26 = vector.load %arg2[%c10, %c0_11] : memref<16x128xf32, #tpu.memory_space<vmem>>, vector<1x128xf32>
    %cst_12 = arith.constant dense<0.000000e+00> : vector<8x128xf32>
    %27 = tpu.matmul %23, %25, %cst_12 {dimension_numbers = #tpu.dot_dimension_numbers<[1], [0], [0], [1], [0, 0, 1, 1], [], []>} : vector<8x128xf32>, vector<128x128xf32>, vector<8x128xf32> -> vector<8x128xf32>
    %28 = vector.broadcast %26 : vector<1x128xf32> to vector<8x128xf32>
    %29 = arith.addf %27, %28 : vector<8x128xf32>
    %cst_13 = arith.constant 0.00999999977 : f32
    %30 = vector.broadcast %cst_13 : f32 to vector<8x128xf32>
    %31 = arith.mulf %30, %29 : vector<8x128xf32>
    %32 = arith.maximumf %29, %31 : vector<8x128xf32>
    %c1 = arith.constant 1 : index
    %c0_14 = arith.constant 0 : index
    %33 = vector.load %arg2[%c1, %c0_14] : memref<16x128xf32, #tpu.memory_space<vmem>>, vector<1x128xf32>
    %c6 = arith.constant 6 : index
    %c0_15 = arith.constant 0 : index
    %34 = vector.load %arg2[%c6, %c0_15] : memref<16x128xf32, #tpu.memory_space<vmem>>, vector<1x128xf32>
    %cst_16 = arith.constant dense<0.000000e+00> : vector<128xf32>
    %35 = vector.multi_reduction <add>, %32, %cst_16 [0] : vector<8x128xf32> to vector<128xf32>
    %36 = vector.shape_cast %35 : vector<128xf32> to vector<1x128xf32>
    %37 = arith.mulf %32, %32 : vector<8x128xf32>
    %cst_17 = arith.constant dense<0.000000e+00> : vector<128xf32>
    %38 = vector.multi_reduction <add>, %37, %cst_17 [0] : vector<8x128xf32> to vector<128xf32>
    %39 = vector.shape_cast %38 : vector<128xf32> to vector<1x128xf32>
    %cst_18 = arith.constant 1.250000e-01 : f32
    %40 = vector.broadcast %cst_18 : f32 to vector<1x128xf32>
    %41 = arith.mulf %36, %40 : vector<1x128xf32>
    %cst_19 = arith.constant 1.250000e-01 : f32
    %42 = vector.broadcast %cst_19 : f32 to vector<1x128xf32>
    %43 = arith.mulf %39, %42 : vector<1x128xf32>
    %44 = arith.mulf %41, %41 : vector<1x128xf32>
    %45 = arith.subf %43, %44 : vector<1x128xf32>
    %cst_20 = arith.constant 9.99999974E-6 : f32
    %46 = vector.broadcast %cst_20 : f32 to vector<1x128xf32>
    %47 = arith.addf %45, %46 : vector<1x128xf32>
    %48 = math.rsqrt %47 : vector<1x128xf32>
    %49 = arith.mulf %33, %48 : vector<1x128xf32>
    %50 = arith.mulf %41, %49 : vector<1x128xf32>
    %51 = arith.subf %34, %50 : vector<1x128xf32>
    %52 = vector.broadcast %49 : vector<1x128xf32> to vector<8x128xf32>
    %53 = arith.mulf %32, %52 : vector<8x128xf32>
    %54 = vector.broadcast %51 : vector<1x128xf32> to vector<8x128xf32>
    %55 = arith.addf %53, %54 : vector<8x128xf32>
    %c1_21 = arith.constant 1 : index
    %c0_22 = arith.constant 0 : index
    %c0_23 = arith.constant 0 : index
    %56 = vector.load %arg1[%c1_21, %c0_22, %c0_23] : memref<6x128x128xf32, #tpu.memory_space<vmem>>, vector<1x128x128xf32>
    %57 = vector.shape_cast %56 : vector<1x128x128xf32> to vector<128x128xf32>
    %c11 = arith.constant 11 : index
    %c0_24 = arith.constant 0 : index
    %58 = vector.load %arg2[%c11, %c0_24] : memref<16x128xf32, #tpu.memory_space<vmem>>, vector<1x128xf32>
    %cst_25 = arith.constant dense<0.000000e+00> : vector<8x128xf32>
    %59 = tpu.matmul %55, %57, %cst_25 {dimension_numbers = #tpu.dot_dimension_numbers<[1], [0], [0], [1], [0, 0, 1, 1], [], []>} : vector<8x128xf32>, vector<128x128xf32>, vector<8x128xf32> -> vector<8x128xf32>
    %60 = vector.broadcast %58 : vector<1x128xf32> to vector<8x128xf32>
    %61 = arith.addf %59, %60 : vector<8x128xf32>
    %cst_26 = arith.constant 0.00999999977 : f32
    %62 = vector.broadcast %cst_26 : f32 to vector<8x128xf32>
    %63 = arith.mulf %62, %61 : vector<8x128xf32>
    %64 = arith.maximumf %61, %63 : vector<8x128xf32>
    %c2 = arith.constant 2 : index
    %c0_27 = arith.constant 0 : index
    %65 = vector.load %arg2[%c2, %c0_27] : memref<16x128xf32, #tpu.memory_space<vmem>>, vector<1x128xf32>
    %c7 = arith.constant 7 : index
    %c0_28 = arith.constant 0 : index
    %66 = vector.load %arg2[%c7, %c0_28] : memref<16x128xf32, #tpu.memory_space<vmem>>, vector<1x128xf32>
    %cst_29 = arith.constant dense<0.000000e+00> : vector<128xf32>
    %67 = vector.multi_reduction <add>, %64, %cst_29 [0] : vector<8x128xf32> to vector<128xf32>
    %68 = vector.shape_cast %67 : vector<128xf32> to vector<1x128xf32>
    %69 = arith.mulf %64, %64 : vector<8x128xf32>
    %cst_30 = arith.constant dense<0.000000e+00> : vector<128xf32>
    %70 = vector.multi_reduction <add>, %69, %cst_30 [0] : vector<8x128xf32> to vector<128xf32>
    %71 = vector.shape_cast %70 : vector<128xf32> to vector<1x128xf32>
    %cst_31 = arith.constant 1.250000e-01 : f32
    %72 = vector.broadcast %cst_31 : f32 to vector<1x128xf32>
    %73 = arith.mulf %68, %72 : vector<1x128xf32>
    %cst_32 = arith.constant 1.250000e-01 : f32
    %74 = vector.broadcast %cst_32 : f32 to vector<1x128xf32>
    %75 = arith.mulf %71, %74 : vector<1x128xf32>
    %76 = arith.mulf %73, %73 : vector<1x128xf32>
    %77 = arith.subf %75, %76 : vector<1x128xf32>
    %cst_33 = arith.constant 9.99999974E-6 : f32
    %78 = vector.broadcast %cst_33 : f32 to vector<1x128xf32>
    %79 = arith.addf %77, %78 : vector<1x128xf32>
    %80 = math.rsqrt %79 : vector<1x128xf32>
    %81 = arith.mulf %65, %80 : vector<1x128xf32>
    %82 = arith.mulf %73, %81 : vector<1x128xf32>
    %83 = arith.subf %66, %82 : vector<1x128xf32>
    %84 = vector.broadcast %81 : vector<1x128xf32> to vector<8x128xf32>
    %85 = arith.mulf %64, %84 : vector<8x128xf32>
    %86 = vector.broadcast %83 : vector<1x128xf32> to vector<8x128xf32>
    %87 = arith.addf %85, %86 : vector<8x128xf32>
    %c2_34 = arith.constant 2 : index
    %c0_35 = arith.constant 0 : index
    %c0_36 = arith.constant 0 : index
    %88 = vector.load %arg1[%c2_34, %c0_35, %c0_36] : memref<6x128x128xf32, #tpu.memory_space<vmem>>, vector<1x128x128xf32>
    %89 = vector.shape_cast %88 : vector<1x128x128xf32> to vector<128x128xf32>
    %c12 = arith.constant 12 : index
    %c0_37 = arith.constant 0 : index
    %90 = vector.load %arg2[%c12, %c0_37] : memref<16x128xf32, #tpu.memory_space<vmem>>, vector<1x128xf32>
    %cst_38 = arith.constant dense<0.000000e+00> : vector<8x128xf32>
    %91 = tpu.matmul %87, %89, %cst_38 {dimension_numbers = #tpu.dot_dimension_numbers<[1], [0], [0], [1], [0, 0, 1, 1], [], []>} : vector<8x128xf32>, vector<128x128xf32>, vector<8x128xf32> -> vector<8x128xf32>
    %92 = vector.broadcast %90 : vector<1x128xf32> to vector<8x128xf32>
    %93 = arith.addf %91, %92 : vector<8x128xf32>
    %cst_39 = arith.constant 0.00999999977 : f32
    %94 = vector.broadcast %cst_39 : f32 to vector<8x128xf32>
    %95 = arith.mulf %94, %93 : vector<8x128xf32>
    %96 = arith.maximumf %93, %95 : vector<8x128xf32>
    %c3 = arith.constant 3 : index
    %c0_40 = arith.constant 0 : index
    %97 = vector.load %arg2[%c3, %c0_40] : memref<16x128xf32, #tpu.memory_space<vmem>>, vector<1x128xf32>
    %c8 = arith.constant 8 : index
    %c0_41 = arith.constant 0 : index
    %98 = vector.load %arg2[%c8, %c0_41] : memref<16x128xf32, #tpu.memory_space<vmem>>, vector<1x128xf32>
    %cst_42 = arith.constant dense<0.000000e+00> : vector<128xf32>
    %99 = vector.multi_reduction <add>, %96, %cst_42 [0] : vector<8x128xf32> to vector<128xf32>
    %100 = vector.shape_cast %99 : vector<128xf32> to vector<1x128xf32>
    %101 = arith.mulf %96, %96 : vector<8x128xf32>
    %cst_43 = arith.constant dense<0.000000e+00> : vector<128xf32>
    %102 = vector.multi_reduction <add>, %101, %cst_43 [0] : vector<8x128xf32> to vector<128xf32>
    %103 = vector.shape_cast %102 : vector<128xf32> to vector<1x128xf32>
    %cst_44 = arith.constant 1.250000e-01 : f32
    %104 = vector.broadcast %cst_44 : f32 to vector<1x128xf32>
    %105 = arith.mulf %100, %104 : vector<1x128xf32>
    %cst_45 = arith.constant 1.250000e-01 : f32
    %106 = vector.broadcast %cst_45 : f32 to vector<1x128xf32>
    %107 = arith.mulf %103, %106 : vector<1x128xf32>
    %108 = arith.mulf %105, %105 : vector<1x128xf32>
    %109 = arith.subf %107, %108 : vector<1x128xf32>
    %cst_46 = arith.constant 9.99999974E-6 : f32
    %110 = vector.broadcast %cst_46 : f32 to vector<1x128xf32>
    %111 = arith.addf %109, %110 : vector<1x128xf32>
    %112 = math.rsqrt %111 : vector<1x128xf32>
    %113 = arith.mulf %97, %112 : vector<1x128xf32>
    %114 = arith.mulf %105, %113 : vector<1x128xf32>
    %115 = arith.subf %98, %114 : vector<1x128xf32>
    %116 = vector.broadcast %113 : vector<1x128xf32> to vector<8x128xf32>
    %117 = arith.mulf %96, %116 : vector<8x128xf32>
    %118 = vector.broadcast %115 : vector<1x128xf32> to vector<8x128xf32>
    %119 = arith.addf %117, %118 : vector<8x128xf32>
    %c3_47 = arith.constant 3 : index
    %c0_48 = arith.constant 0 : index
    %c0_49 = arith.constant 0 : index
    %120 = vector.load %arg1[%c3_47, %c0_48, %c0_49] : memref<6x128x128xf32, #tpu.memory_space<vmem>>, vector<1x128x128xf32>
    %121 = vector.shape_cast %120 : vector<1x128x128xf32> to vector<128x128xf32>
    %c13 = arith.constant 13 : index
    %c0_50 = arith.constant 0 : index
    %122 = vector.load %arg2[%c13, %c0_50] : memref<16x128xf32, #tpu.memory_space<vmem>>, vector<1x128xf32>
    %cst_51 = arith.constant dense<0.000000e+00> : vector<8x128xf32>
    %123 = tpu.matmul %119, %121, %cst_51 {dimension_numbers = #tpu.dot_dimension_numbers<[1], [0], [0], [1], [0, 0, 1, 1], [], []>} : vector<8x128xf32>, vector<128x128xf32>, vector<8x128xf32> -> vector<8x128xf32>
    %124 = vector.broadcast %122 : vector<1x128xf32> to vector<8x128xf32>
    %125 = arith.addf %123, %124 : vector<8x128xf32>
    %cst_52 = arith.constant 0.00999999977 : f32
    %126 = vector.broadcast %cst_52 : f32 to vector<8x128xf32>
    %127 = arith.mulf %126, %125 : vector<8x128xf32>
    %128 = arith.maximumf %125, %127 : vector<8x128xf32>
    %c4 = arith.constant 4 : index
    %c0_53 = arith.constant 0 : index
    %129 = vector.load %arg2[%c4, %c0_53] : memref<16x128xf32, #tpu.memory_space<vmem>>, vector<1x128xf32>
    %c9 = arith.constant 9 : index
    %c0_54 = arith.constant 0 : index
    %130 = vector.load %arg2[%c9, %c0_54] : memref<16x128xf32, #tpu.memory_space<vmem>>, vector<1x128xf32>
    %cst_55 = arith.constant dense<0.000000e+00> : vector<128xf32>
    %131 = vector.multi_reduction <add>, %128, %cst_55 [0] : vector<8x128xf32> to vector<128xf32>
    %132 = vector.shape_cast %131 : vector<128xf32> to vector<1x128xf32>
    %133 = arith.mulf %128, %128 : vector<8x128xf32>
    %cst_56 = arith.constant dense<0.000000e+00> : vector<128xf32>
    %134 = vector.multi_reduction <add>, %133, %cst_56 [0] : vector<8x128xf32> to vector<128xf32>
    %135 = vector.shape_cast %134 : vector<128xf32> to vector<1x128xf32>
    %cst_57 = arith.constant 1.250000e-01 : f32
    %136 = vector.broadcast %cst_57 : f32 to vector<1x128xf32>
    %137 = arith.mulf %132, %136 : vector<1x128xf32>
    %cst_58 = arith.constant 1.250000e-01 : f32
    %138 = vector.broadcast %cst_58 : f32 to vector<1x128xf32>
    %139 = arith.mulf %135, %138 : vector<1x128xf32>
    %140 = arith.mulf %137, %137 : vector<1x128xf32>
    %141 = arith.subf %139, %140 : vector<1x128xf32>
    %cst_59 = arith.constant 9.99999974E-6 : f32
    %142 = vector.broadcast %cst_59 : f32 to vector<1x128xf32>
    %143 = arith.addf %141, %142 : vector<1x128xf32>
    %144 = math.rsqrt %143 : vector<1x128xf32>
    %145 = arith.mulf %129, %144 : vector<1x128xf32>
    %146 = arith.mulf %137, %145 : vector<1x128xf32>
    %147 = arith.subf %130, %146 : vector<1x128xf32>
    %148 = vector.broadcast %145 : vector<1x128xf32> to vector<8x128xf32>
    %149 = arith.mulf %128, %148 : vector<8x128xf32>
    %150 = vector.broadcast %147 : vector<1x128xf32> to vector<8x128xf32>
    %151 = arith.addf %149, %150 : vector<8x128xf32>
    %c4_60 = arith.constant 4 : index
    %c0_61 = arith.constant 0 : index
    %c0_62 = arith.constant 0 : index
    %152 = vector.load %arg1[%c4_60, %c0_61, %c0_62] : memref<6x128x128xf32, #tpu.memory_space<vmem>>, vector<1x128x128xf32>
    %153 = vector.shape_cast %152 : vector<1x128x128xf32> to vector<128x128xf32>
    %c14 = arith.constant 14 : index
    %c0_63 = arith.constant 0 : index
    %154 = vector.load %arg2[%c14, %c0_63] : memref<16x128xf32, #tpu.memory_space<vmem>>, vector<1x128xf32>
    %cst_64 = arith.constant dense<0.000000e+00> : vector<8x128xf32>
    %155 = tpu.matmul %151, %153, %cst_64 {dimension_numbers = #tpu.dot_dimension_numbers<[1], [0], [0], [1], [0, 0, 1, 1], [], []>} : vector<8x128xf32>, vector<128x128xf32>, vector<8x128xf32> -> vector<8x128xf32>
    %156 = vector.broadcast %154 : vector<1x128xf32> to vector<8x128xf32>
    %157 = arith.addf %155, %156 : vector<8x128xf32>
    %cst_65 = arith.constant 0.00999999977 : f32
    %158 = vector.broadcast %cst_65 : f32 to vector<8x128xf32>
    %159 = arith.mulf %158, %157 : vector<8x128xf32>
    %160 = arith.maximumf %157, %159 : vector<8x128xf32>
    %c5_66 = arith.constant 5 : index
    %c0_67 = arith.constant 0 : index
    %c0_68 = arith.constant 0 : index
    %161 = vector.load %arg1[%c5_66, %c0_67, %c0_68] : memref<6x128x128xf32, #tpu.memory_space<vmem>>, vector<1x128x128xf32>
    %162 = vector.shape_cast %161 : vector<1x128x128xf32> to vector<128x128xf32>
    %c15 = arith.constant 15 : index
    %c0_69 = arith.constant 0 : index
    %163 = vector.load %arg2[%c15, %c0_69] : memref<16x128xf32, #tpu.memory_space<vmem>>, vector<1x128xf32>
    %cst_70 = arith.constant dense<0.000000e+00> : vector<8x128xf32>
    %164 = tpu.matmul %160, %162, %cst_70 {dimension_numbers = #tpu.dot_dimension_numbers<[1], [0], [0], [1], [0, 0, 1, 1], [], []>} : vector<8x128xf32>, vector<128x128xf32>, vector<8x128xf32> -> vector<8x128xf32>
    %165 = vector.broadcast %163 : vector<1x128xf32> to vector<8x128xf32>
    %166 = arith.addf %164, %165 : vector<8x128xf32>
    %c0_71 = arith.constant 0 : index
    %c0_72 = arith.constant 0 : index
    %167 = vector.load %arg3[%c0_71, %c0_72] : memref<8x128xf32, #tpu.memory_space<vmem>>, vector<8x128xf32>
    tpu.vector_store %arg3[%c0_71, %c0_72], %166 {strides = array<i32>} : memref<8x128xf32, #tpu.memory_space<vmem>>, vector<8x128xf32>,
    return
  }
}

</mosaic_0001>

<bundles_post_ra>
// kernel: tpu_custom_call.1
= control target key start
LH: loop header
LB: loop body
LE: loop exit
PB: predicated region body
PF: predicated region fallthrough
CT: control target
= control target key end

     0   :  { %8 = vsyncpa [#allocation3], 0  ;;  %s677_s0 = inlined_call_operand.hbm [shape: f32[8,128], index: 0, kind: input, shape index: {}]   ;;  %s678_s1 = inlined_call_operand.hbm [shape: f32[6,128,128], index: 1, kind: input, shape index: {}]   ;;  %s679_s2 = inlined_call_operand.hbm [shape: f32[16,128], index: 2, kind: input, shape index: {}]   ;;  %s680_s3 = inlined_call_operand.hbm [shape: f32[8,128], index: 3, kind: output, shape index: {}]  }
   0x1   :  { %9 = vsyncpa [#allocation6], 0  ;;  %s26_s14 = sshll.u32 %s678_s1, 4  ;;  %s27_s14 = int_to_ptr.hbm [resolvable:$true] %s26_s14 }
   0x2   :  { %10 = vsyncpa [#allocation4], 0  ;;  %s632_s15 = smov [#allocation5]   ;;  %s16_s19 = sshll.u32 %s677_s0, 4  ;;  %s17_s19 = int_to_ptr.hbm [resolvable:$true] %s16_s19 }
   0x3   :  { %s28_s16 = sshll.u32 %s632_s15, 4  ;;  %s633_s20 = smov 128   ;;  %s29_s16 = int_to_ptr.vmem [resolvable:$true] %s28_s16 }
   0x4   :  { %s634_s21 = smov 8   ;;  %s635_s22 = smov [#allocation2]  }
   0x5   :  { %34 = dma.hbm_to_vmem [thread:$0]  %s27_s14, 12288, %s29_s16, [#allocation6], %s633_s20, %s633_s20, %s634_s21  }
   0x6   :  { %s18_s23 = sshll.u32 %s635_s22, 4  ;;  %s39_s26 = sshll.u32 %s679_s2, 4  ;;  %s19_s23 = int_to_ptr.vmem [resolvable:$true] %s18_s23  ;;  %s40_s26 = int_to_ptr.hbm [resolvable:$true] %s39_s26 }
   0x7   :  { %21 = dma.hbm_to_vmem [thread:$0]  %s17_s19, 128, %s19_s23, [#allocation3]  }
   0x8   :  { %s636_s1 = smov [#allocation7]  }
   0x9   :  { %s41_s27 = sshll.u32 %s636_s1, 4  ;;  %s42_s27 = int_to_ptr.vmem [resolvable:$true] %s41_s27 }
   0xa   :  { %47 = dma.hbm_to_vmem [thread:$0]  %s40_s26, 256, %s42_s27, [#allocation6], %s633_s20, %s633_s20, %s634_s21  }
   0xb   :  { %626 = dma.done.wait [#allocation3], 128  }
   0xc   :  { %627 = vsyncadd [#allocation3], 4294967168 }
   0xd   :  { %628 = dma.done.wait [#allocation6], 12544  }
   0xe   :  { %629 = vsyncadd [#allocation6], 4294954752  ;;  %v113_v0 = vld [vmem:[#allocation5 + $0x78] sm:$0xff]  ;;  %v112_v1 = vld [vmem:[#allocation5 + $0x70] sm:$0xff]  ;;  %s637_s0 = smov [#allocation8]   ;;  %s497_s30 = sshll.u32 %s680_s3, 4  ;;  %s498_s30 = int_to_ptr.hbm [resolvable:$true] %s497_s30 }
   0xf   :  { %116 = vmatpush.msra.mxu0 %v113_v0  ;;  %v111_v2 = vld [vmem:[#allocation5 + $0x68] sm:$0xff]  ;;  %v110_v3 = vld [vmem:[#allocation5 + $0x60] sm:$0xff]  ;;  %v60_v4 = vld [vmem:[#allocation2] sm:$0xff]  ;;  %s495_s2 = sshll.u32 %s637_s0, 4  ;;  %s496_s2 = int_to_ptr.vmem [resolvable:$true] %s495_s2 }
  0x10   :  { %v109_v5 = vld [vmem:[#allocation5 + $0x58] sm:$0xff]  ;;  %v63_v6 = vrot.slane %v60_v4, 4  ;;  %v69_v7 = vmul.f32 %v60_v4, %v60_v4  ;;  %v108_v8 = vld [vmem:[#allocation5 + $0x50] sm:$0xff]  ;;  %v107_v11 = vld [vmem:[#allocation5 + $0x48] sm:$0xff] }
  0x11   :  { %117 = vmatpush.msra.mxu0 %v112_v1  ;;  %v106_v14 = vld [vmem:[#allocation5 + $0x40] sm:$0xff]  ;;  %v105_v17 = vld [vmem:[#allocation5 + $0x38] sm:$0xff]  ;;  %v104_v20 = vld [vmem:[#allocation5 + $0x30] sm:$0xff] }
  0x12   :  { %v64_v9 = vadd.f32 %v63_v6, %v60_v4  ;;  %v70_v10 = vrot.slane %v69_v7, 4  ;;  %v103_v23 = vld [vmem:[#allocation5 + $0x28] sm:$0xff]  ;;  %v102_v26 = vld [vmem:[#allocation5 + $0x20] sm:$0xff]  ;;  %v101_v29 = vld [vmem:[#allocation5 + $0x18] sm:$0xff] }
  0x13   :  { %118 = vmatpush.msra.mxu0 %v111_v2  ;;  %v100_v31 = vld [vmem:[#allocation5 + $0x10] sm:$0xff]  ;;  %v99_v33 = vld [vmem:[#allocation5 + $0x8] sm:$0xff]  ;;  %v98_v34 = vld [vmem:[#allocation5] sm:$0xff] }
  0x14   :  { %v65_v12 = vrot.slane %v64_v9, 2  ;;  %v71_v13 = vadd.f32 %v70_v10, %v69_v7  ;;  %v61_v40 = vld [vmem:[#allocation7] sm:$0x1]  ;;  %v62_v44 = vld [vmem:[#allocation7 + $0x5] sm:$0x1]  ;;  %v191_v51 = vld [vmem:[#allocation5 + $0xf8] sm:$0xff] }
  0x15   :  { %119 = vmatpush.msra.mxu0 %v110_v3  ;;  %v190_v52 = vld [vmem:[#allocation5 + $0xf0] sm:$0xff]  ;;  %194 = vmatpush.msra.mxu1 %v191_v51  ;;  %v189_v53 = vld [vmem:[#allocation5 + $0xe8] sm:$0xff]  ;;  %v188_v54 = vld [vmem:[#allocation5 + $0xe0] sm:$0xff] }
  0x16   :  { %v66_v15 = vadd.f32 %v65_v12, %v64_v9  ;;  %v72_v16 = vrot.slane %v71_v13, 2  ;;  %v187_v55 = vld [vmem:[#allocation5 + $0xd8] sm:$0xff]  ;;  %v186_v56 = vld [vmem:[#allocation5 + $0xd0] sm:$0xff]  ;;  %v185_v57 = vld [vmem:[#allocation5 + $0xc8] sm:$0xff] }
  0x17   :  { %120 = vmatpush.msra.mxu0 %v109_v5  ;;  %195 = vmatpush.msra.mxu1 %v190_v52  ;;  %v184_v58 = vld [vmem:[#allocation5 + $0xc0] sm:$0xff]  ;;  %v514_v59 = vld [vmem:[#allocation7 + $0xa] ss:$0 sm:$0xff]  ;;  %v183_v60 = vld [vmem:[#allocation5 + $0xb8] sm:$0xff] }
  0x18   :  { %v67_v18 = vrot.slane %v66_v15, 1  ;;  %v73_v19 = vadd.f32 %v72_v16, %v71_v13  ;;  %v182_v61 = vld [vmem:[#allocation5 + $0xb0] sm:$0xff]  ;;  %v181_v0 = vld [vmem:[#allocation5 + $0xa8] sm:$0xff]  ;;  %v180_v2 = vld [vmem:[#allocation5 + $0xa0] sm:$0xff] }
  0x19   :  { %121 = vmatpush.msra.mxu0 %v108_v8  ;;  %196 = vmatpush.msra.mxu1 %v189_v53  ;;  %v178_v7 = vld [vmem:[#allocation5 + $0x90] sm:$0xff]  ;;  %v177_v10 = vld [vmem:[#allocation5 + $0x88] sm:$0xff]  ;;  %v176_v12 = vld [vmem:[#allocation5 + $0x80] sm:$0xff] }
  0x1a   :  { %v68_v21 = vadd.f32 %v67_v18, %v66_v15  ;;  %v74_v22 = vrot.slane %v73_v19, 1  ;;  %v261_v51 = vld [vmem:[#allocation5 + $0x138] sm:$0xff]  ;;  %v260_v52 = vld [vmem:[#allocation5 + $0x130] sm:$0xff] }
  0x1b   :  { %122 = vmatpush.msra.mxu0 %v107_v11  ;;  %197 = vmatpush.msra.mxu1 %v188_v54 }
  0x1c   :  { %v75_v24 = vadd.f32 %v74_v22, %v73_v19  ;;  %v76_v25 = vmul.f32 0.125, %v68_v21 }
  0x1d   :  { %123 = vmatpush.msra.mxu0 %v106_v14  ;;  %198 = vmatpush.msra.mxu1 %v187_v55  ;;  %v259_v55 = vld [vmem:[#allocation5 + $0x128] sm:$0xff] }
  0x1e   :  { %v77_v27 = vmul.f32 0.125, %v75_v24  ;;  %v78_v28 = vmul.f32 %v76_v25, %v76_v25 }
  0x1f   :  { %124 = vmatpush.msra.mxu0 %v105_v17  ;;  %199 = vmatpush.msra.mxu1 %v186_v56 }
  0x20   :  { %v79_v30 = vsub.f32 %v77_v27, %v78_v28 }
  0x21   :  { %125 = vmatpush.msra.mxu0 %v104_v20  ;;  %200 = vmatpush.msra.mxu1 %v185_v57  ;;  %v258_v57 = vld [vmem:[#allocation5 + $0x120] sm:$0xff] }
  0x22   :  { %v80_v32 = vadd.f32 1e-05, %v79_v30 }
  0x23   :  { %126 = vmatpush.msra.mxu0 %v103_v23  ;;  %201 = vmatpush.msra.mxu1 %v184_v58 }
  0x24   :  { %520 = vrsqrt.f32 %v80_v32  ;;  %vm87_vm0 = vweird.f32 %v80_v32 }
  0x25   :  { %127 = vmatpush.msra.mxu0 %v102_v26  ;;  %202 = vmatpush.msra.mxu1 %v183_v60 }
  0x27   :  { %128 = vmatpush.msra.mxu0 %v101_v29  ;;  %203 = vmatpush.msra.mxu1 %v182_v61 }
  0x29   :  { %129 = vmatpush.msra.mxu0 %v100_v31  ;;  %204 = vmatpush.msra.mxu1 %v181_v0  ;;  %v138_v31 = vld [vmem:[#allocation7 + $0x1] sm:$0x1] }
  0x2a   :  { %v521_v35 = vpop.eup %520 }
  0x2b   :  { %130 = vmatpush.msra.mxu0 %v99_v33  ;;  %v82_v36 = vmul.f32 %v521_v35, %v80_v32  ;;  %vm88_vm1 = vweird.f32 %v521_v35  ;;  %205 = vmatpush.msra.mxu1 %v180_v2 }
  0x2c   :  { %vm89_vm2 = vmor %vm87_vm0, %vm88_vm1 }
  0x2d   :  { %131 = vmatpush.msra.mxu0 %v98_v34  ;;  %v83_v37 = vmul.f32 %v521_v35, %v82_v36 }
  0x2f   :  { %v84_v38 = vmul.f32 0.5, %v83_v37 }
  0x31   :  { %v85_v39 = vsub.f32 1.5, %v84_v38 }
  0x33   :  { %v86_v41 = vmul.f32 %v521_v35, %v85_v39 }
  0x35   :  { %v90_v42 = vsel %vm89_vm2, %v521_v35, %v86_v41  ;;  %v139_v35 = vld [vmem:[#allocation7 + $0x6] sm:$0x1] }
  0x36   :  { %v91_v43 = vmul.f32 %v90_v42, %v61_v40  ;;  %v269_v42 = vld [vmem:[#allocation5 + $0x178] sm:$0xff] }
  0x37   :  { %272 = vmatpush.msra.mxu2 %v269_v42  ;;  %v339_v42 = vld [vmem:[#allocation5 + $0x1b8] sm:$0xff] }
  0x38   :  { %v92_v45 = vmul.f32 %v91_v43, %v76_v25  ;;  %v94_v46 = vperm.slane %v91_v43, 0  ;;  %v268_v43 = vld [vmem:[#allocation5 + $0x170] sm:$0xff] }
  0x39   :  { %273 = vmatpush.msra.mxu2 %v268_v43  ;;  %v338_v43 = vld [vmem:[#allocation5 + $0x1b0] sm:$0xff] }
  0x3a   :  { %v93_v47 = vsub.f32 %v62_v44, %v92_v45  ;;  %v95_v48 = vmul.f32 %v94_v46, %v60_v4  ;;  %v179_v4 = vld [vmem:[#allocation5 + $0x98] sm:$0xff]  ;;  %v267_v44 = vld [vmem:[#allocation5 + $0x168] sm:$0xff]  ;;  %v266_v45 = vld [vmem:[#allocation5 + $0x160] sm:$0xff] }
  0x3b   :  { %206 = vmatpush.msra.mxu1 %v179_v4  ;;  %274 = vmatpush.msra.mxu2 %v267_v44  ;;  %v265_v46 = vld [vmem:[#allocation5 + $0x158] sm:$0xff] }
  0x3c   :  { %v96_v49 = vperm.slane %v93_v47, 0  ;;  %v264_v47 = vld [vmem:[#allocation5 + $0x150] sm:$0xff] }
  0x3d   :  { %207 = vmatpush.msra.mxu1 %v178_v7  ;;  %275 = vmatpush.msra.mxu2 %v266_v45 }
  0x3e   :  { %v97_v50 = vadd.f32 %v96_v49, %v95_v48  ;;  %v263_v48 = vld [vmem:[#allocation5 + $0x148] sm:$0xff]  ;;  %v262_v49 = vld [vmem:[#allocation5 + $0x140] sm:$0xff] }
  0x3f   :  { %208 = vmatpush.msra.mxu1 %v177_v10  ;;  %276 = vmatpush.msra.mxu2 %v265_v46  ;;  %v337_v46 = vld [vmem:[#allocation5 + $0x1a8] sm:$0xff] }
  0x40   :  { %132 = vmatmul.f32.vlgmr.msra.gmra.mxu0 %v97_v50  ;;  %v515_v50 = vld [vmem:[#allocation7 + $0xb] ss:$0 sm:$0xff] }
  0x41   :  { %209 = vmatpush.msra.mxu1 %v176_v12  ;;  %277 = vmatpush.msra.mxu2 %v264_v47 }
  0x43   :  { %278 = vmatpush.msra.mxu2 %v263_v48  ;;  %v336_v48 = vld [vmem:[#allocation5 + $0x1a0] sm:$0xff] }
  0x45   :  { %279 = vmatpush.msra.mxu2 %v262_v49 }
  0x47   :  { %280 = vmatpush.msra.mxu2 %v261_v51 }
  0x49   :  { %281 = vmatpush.msra.mxu2 %v260_v52 }
  0x4b   :  { %282 = vmatpush.msra.mxu2 %v259_v55 }
  0x4d   :  { %283 = vmatpush.msra.mxu2 %v258_v57 }
  0xbd   :  { %v133_v62 = vpop.f32.mrf.mxu0 }
  0xbe   :  { %v134_v63 = vadd.f32 %v514_v59, %v133_v62  ;;  %v257_v59 = vld [vmem:[#allocation5 + $0x118] sm:$0xff]  ;;  %v256_v62 = vld [vmem:[#allocation5 + $0x110] sm:$0xff] }
  0xbf   :  { %284 = vmatpush.msra.mxu2 %v257_v59 }
  0xc0   :  { %v136_v1 = vmul.f32 0.01, %v134_v63 }
  0xc1   :  { %285 = vmatpush.msra.mxu2 %v256_v62 }
  0xc2   :  { %v137_v3 = vmax.f32 %v134_v63, %v136_v1  ;;  %v255_v1 = vld [vmem:[#allocation5 + $0x108] sm:$0xff] }
  0xc3   :  { %286 = vmatpush.msra.mxu2 %v255_v1 }
  0xc4   :  { %v140_v5 = vrot.slane %v137_v3, 4  ;;  %v146_v6 = vmul.f32 %v137_v3, %v137_v3 }
  0xc6   :  { %v141_v8 = vadd.f32 %v140_v5, %v137_v3  ;;  %v147_v9 = vrot.slane %v146_v6, 4 }
  0xc8   :  { %v148_v11 = vadd.f32 %v147_v9, %v146_v6  ;;  %v142_v13 = vrot.slane %v141_v8, 2 }
  0xca   :  { %v149_v14 = vrot.slane %v148_v11, 2  ;;  %v143_v15 = vadd.f32 %v142_v13, %v141_v8 }
  0xcc   :  { %v150_v16 = vadd.f32 %v149_v14, %v148_v11  ;;  %v144_v17 = vrot.slane %v143_v15, 1 }
  0xce   :  { %v145_v18 = vadd.f32 %v144_v17, %v143_v15  ;;  %v151_v19 = vrot.slane %v150_v16, 1 }
  0xd0   :  { %v152_v20 = vadd.f32 %v151_v19, %v150_v16  ;;  %v153_v21 = vmul.f32 0.125, %v145_v18 }
  0xd2   :  { %v154_v22 = vmul.f32 0.125, %v152_v20  ;;  %v155_v23 = vmul.f32 %v153_v21, %v153_v21 }
  0xd4   :  { %v156_v24 = vsub.f32 %v154_v22, %v155_v23  ;;  %v216_v22 = vld [vmem:[#allocation7 + $0x2] sm:$0x1] }
  0xd6   :  { %v157_v25 = vadd.f32 1e-05, %v156_v24 }
  0xd8   :  { %522 = vrsqrt.f32 %v157_v25  ;;  %vm164_vm4 = vweird.f32 %v157_v25 }
  0xde   :  { %v523_v26 = vpop.eup %522 }
  0xdf   :  { %v159_v27 = vmul.f32 %v523_v26, %v157_v25  ;;  %vm165_vm3 = vweird.f32 %v523_v26 }
  0xe0   :  { %vm166_vm5 = vmor %vm164_vm4, %vm165_vm3 }
  0xe1   :  { %v160_v28 = vmul.f32 %v523_v26, %v159_v27 }
  0xe3   :  { %v161_v29 = vmul.f32 0.5, %v160_v28 }
  0xe5   :  { %v162_v30 = vsub.f32 1.5, %v161_v29 }
  0xe7   :  { %v163_v32 = vmul.f32 %v523_v26, %v162_v30 }
  0xe9   :  { %v167_v33 = vsel %vm166_vm5, %v523_v26, %v163_v32  ;;  %v217_v26 = vld [vmem:[#allocation7 + $0x7] sm:$0x1] }
  0xea   :  { %v168_v34 = vmul.f32 %v167_v33, %v138_v31  ;;  %v347_v33 = vld [vmem:[#allocation5 + $0x1f8] sm:$0xff] }
  0xeb   :  { %350 = vmatpush.msra.mxu3 %v347_v33 }
  0xec   :  { %v169_v36 = vmul.f32 %v168_v34, %v153_v21  ;;  %v171_v37 = vperm.slane %v168_v34, 0  ;;  %v346_v34 = vld [vmem:[#allocation5 + $0x1f0] sm:$0xff] }
  0xed   :  { %351 = vmatpush.msra.mxu3 %v346_v34 }
  0xee   :  { %v170_v38 = vsub.f32 %v139_v35, %v169_v36  ;;  %v172_v39 = vmul.f32 %v171_v37, %v137_v3  ;;  %v254_v3 = vld [vmem:[#allocation5 + $0x100] sm:$0xff]  ;;  %v345_v35 = vld [vmem:[#allocation5 + $0x1e8] sm:$0xff]  ;;  %v343_v37 = vld [vmem:[#allocation5 + $0x1d8] sm:$0xff] }
  0xef   :  { %287 = vmatpush.msra.mxu2 %v254_v3  ;;  %v344_v36 = vld [vmem:[#allocation5 + $0x1e0] sm:$0xff]  ;;  %352 = vmatpush.msra.mxu3 %v345_v35  ;;  %v417_v35 = vld [vmem:[#allocation5 + $0x238] sm:$0xff] }
  0xf0   :  { %v173_v40 = vperm.slane %v170_v38, 0  ;;  %v342_v38 = vld [vmem:[#allocation5 + $0x1d0] sm:$0xff] }
  0xf1   :  { %353 = vmatpush.msra.mxu3 %v344_v36 }
  0xf2   :  { %v174_v41 = vadd.f32 %v173_v40, %v172_v39  ;;  %v341_v39 = vld [vmem:[#allocation5 + $0x1c8] sm:$0xff]  ;;  %v340_v40 = vld [vmem:[#allocation5 + $0x1c0] sm:$0xff] }
  0xf3   :  { %354 = vmatpush.msra.mxu3 %v343_v37  ;;  %v416_v37 = vld [vmem:[#allocation5 + $0x230] sm:$0xff] }
  0xf4   :  { %210 = vmatmul.f32.vlgmr.msra.gmra.mxu1 %v174_v41  ;;  %v516_v41 = vld [vmem:[#allocation7 + $0xc] ss:$0 sm:$0xff] }
  0xf5   :  { %355 = vmatpush.msra.mxu3 %v342_v38 }
  0xf7   :  { %356 = vmatpush.msra.mxu3 %v341_v39  ;;  %v415_v39 = vld [vmem:[#allocation5 + $0x228] sm:$0xff] }
  0xf9   :  { %357 = vmatpush.msra.mxu3 %v340_v40 }
  0xfb   :  { %358 = vmatpush.msra.mxu3 %v339_v42  ;;  %v414_v42 = vld [vmem:[#allocation5 + $0x220] sm:$0xff] }
  0xfd   :  { %359 = vmatpush.msra.mxu3 %v338_v43 }
  0xff   :  { %360 = vmatpush.msra.mxu3 %v337_v46 }
 0x101   :  { %361 = vmatpush.msra.mxu3 %v336_v48  ;;  %v412_v48 = vld [vmem:[#allocation5 + $0x210] sm:$0xff] }
 0x171   :  { %v211_v53 = vpop.f32.mrf.mxu1 }
 0x172   :  { %v212_v54 = vadd.f32 %v515_v50, %v211_v53  ;;  %v335_v50 = vld [vmem:[#allocation5 + $0x198] sm:$0xff]  ;;  %v334_v53 = vld [vmem:[#allocation5 + $0x190] sm:$0xff] }
 0x173   :  { %362 = vmatpush.msra.mxu3 %v335_v50 }
 0x174   :  { %v214_v56 = vmul.f32 0.01, %v212_v54 }
 0x175   :  { %363 = vmatpush.msra.mxu3 %v334_v53  ;;  %v410_v53 = vld [vmem:[#allocation5 + $0x200] sm:$0xff] }
 0x176   :  { %v215_v58 = vmax.f32 %v212_v54, %v214_v56  ;;  %v333_v56 = vld [vmem:[#allocation5 + $0x188] sm:$0xff] }
 0x177   :  { %364 = vmatpush.msra.mxu3 %v333_v56 }
 0x178   :  { %v218_v60 = vrot.slane %v215_v58, 4  ;;  %v224_v61 = vmul.f32 %v215_v58, %v215_v58 }
 0x17a   :  { %v219_v63 = vadd.f32 %v218_v60, %v215_v58  ;;  %v225_v0 = vrot.slane %v224_v61, 4 }
 0x17c   :  { %v226_v2 = vadd.f32 %v225_v0, %v224_v61  ;;  %v220_v4 = vrot.slane %v219_v63, 2 }
 0x17e   :  { %v227_v5 = vrot.slane %v226_v2, 2  ;;  %v221_v6 = vadd.f32 %v220_v4, %v219_v63 }
 0x180   :  { %v228_v7 = vadd.f32 %v227_v5, %v226_v2  ;;  %v222_v8 = vrot.slane %v221_v6, 1 }
 0x182   :  { %v223_v9 = vadd.f32 %v222_v8, %v221_v6  ;;  %v229_v10 = vrot.slane %v228_v7, 1 }
 0x184   :  { %v230_v11 = vadd.f32 %v229_v10, %v228_v7  ;;  %v231_v12 = vmul.f32 0.125, %v223_v9 }
 0x186   :  { %v232_v13 = vmul.f32 0.125, %v230_v11  ;;  %v233_v14 = vmul.f32 %v231_v12, %v231_v12 }
 0x188   :  { %v234_v15 = vsub.f32 %v232_v13, %v233_v14  ;;  %v294_v13 = vld [vmem:[#allocation7 + $0x3] sm:$0x1] }
 0x18a   :  { %v235_v16 = vadd.f32 1e-05, %v234_v15 }
 0x18c   :  { %524 = vrsqrt.f32 %v235_v16  ;;  %vm242_vm7 = vweird.f32 %v235_v16 }
 0x192   :  { %v525_v17 = vpop.eup %524 }
 0x193   :  { %v237_v18 = vmul.f32 %v525_v17, %v235_v16  ;;  %vm243_vm6 = vweird.f32 %v525_v17 }
 0x194   :  { %vm244_vm8 = vmor %vm242_vm7, %vm243_vm6 }
 0x195   :  { %v238_v19 = vmul.f32 %v525_v17, %v237_v18 }
 0x197   :  { %v239_v20 = vmul.f32 0.5, %v238_v19 }
 0x199   :  { %v240_v21 = vsub.f32 1.5, %v239_v20 }
 0x19b   :  { %v241_v23 = vmul.f32 %v525_v17, %v240_v21 }
 0x19d   :  { %v245_v24 = vsel %vm244_vm8, %v525_v17, %v241_v23  ;;  %v295_v17 = vld [vmem:[#allocation7 + $0x8] sm:$0x1] }
 0x19e   :  { %v246_v25 = vmul.f32 %v245_v24, %v216_v22  ;;  %v425_v24 = vld [vmem:[#allocation5 + $0x278] sm:$0xff] }
 0x19f   :  { %428 = vmatpush.msrb.mxu0 %v425_v24 }
 0x1a0   :  { %v247_v27 = vmul.f32 %v246_v25, %v231_v12  ;;  %v249_v28 = vperm.slane %v246_v25, 0  ;;  %v424_v25 = vld [vmem:[#allocation5 + $0x270] sm:$0xff] }
 0x1a1   :  { %429 = vmatpush.msrb.mxu0 %v424_v25 }
 0x1a2   :  { %v248_v29 = vsub.f32 %v217_v26, %v247_v27  ;;  %v250_v30 = vmul.f32 %v249_v28, %v215_v58  ;;  %v332_v58 = vld [vmem:[#allocation5 + $0x180] sm:$0xff]  ;;  %v423_v26 = vld [vmem:[#allocation5 + $0x268] sm:$0xff]  ;;  %v421_v28 = vld [vmem:[#allocation5 + $0x258] sm:$0xff] }
 0x1a3   :  { %365 = vmatpush.msra.mxu3 %v332_v58  ;;  %v422_v27 = vld [vmem:[#allocation5 + $0x260] sm:$0xff]  ;;  %430 = vmatpush.msrb.mxu0 %v423_v26 }
 0x1a4   :  { %v251_v31 = vperm.slane %v248_v29, 0  ;;  %v420_v29 = vld [vmem:[#allocation5 + $0x250] sm:$0xff] }
 0x1a5   :  { %431 = vmatpush.msrb.mxu0 %v422_v27  ;;  %v454_v27 = vld [vmem:[#allocation5 + $0x298] sm:$0xff] }
 0x1a6   :  { %v252_v32 = vadd.f32 %v251_v31, %v250_v30  ;;  %v517_v30 = vld [vmem:[#allocation7 + $0xd] ss:$0 sm:$0xff] }
 0x1a7   :  { %432 = vmatpush.msrb.mxu0 %v421_v28  ;;  %v419_v31 = vld [vmem:[#allocation5 + $0x248] sm:$0xff]  ;;  %v453_v28 = vld [vmem:[#allocation5 + $0x290] sm:$0xff] }
 0x1a8   :  { %288 = vmatmul.f32.vlgmr.msra.gmra.mxu2 %v252_v32  ;;  %v418_v32 = vld [vmem:[#allocation5 + $0x240] sm:$0xff] }
 0x1a9   :  { %433 = vmatpush.msrb.mxu0 %v420_v29  ;;  %v452_v29 = vld [vmem:[#allocation5 + $0x288] sm:$0xff] }
 0x1ab   :  { %434 = vmatpush.msrb.mxu0 %v419_v31  ;;  %v518_v31 = vld [vmem:[#allocation7 + $0xe] ss:$0 sm:$0xff] }
 0x1ad   :  { %435 = vmatpush.msrb.mxu0 %v418_v32 }
 0x1af   :  { %436 = vmatpush.msrb.mxu0 %v417_v35 }
 0x1b1   :  { %437 = vmatpush.msrb.mxu0 %v416_v37 }
 0x1b3   :  { %438 = vmatpush.msrb.mxu0 %v415_v39 }
 0x1b5   :  { %439 = vmatpush.msrb.mxu0 %v414_v42 }
 0x22b   :  { %v289_v44 = vpop.f32.mrf.mxu2 }
 0x22c   :  { %v290_v45 = vadd.f32 %v516_v41, %v289_v44 }
 0x22e   :  { %v292_v47 = vmul.f32 0.01, %v290_v45 }
 0x230   :  { %v293_v49 = vmax.f32 %v290_v45, %v292_v47  ;;  %v413_v45 = vld [vmem:[#allocation5 + $0x218] sm:$0xff] }
 0x231   :  { %440 = vmatpush.msrb.mxu0 %v413_v45 }
 0x232   :  { %v296_v51 = vrot.slane %v293_v49, 4  ;;  %v302_v52 = vmul.f32 %v293_v49, %v293_v49 }
 0x233   :  { %441 = vmatpush.msrb.mxu0 %v412_v48 }
 0x234   :  { %v297_v54 = vadd.f32 %v296_v51, %v293_v49  ;;  %v303_v55 = vrot.slane %v302_v52, 4  ;;  %v411_v51 = vld [vmem:[#allocation5 + $0x208] sm:$0xff] }
 0x235   :  { %442 = vmatpush.msrb.mxu0 %v411_v51 }
 0x236   :  { %v304_v57 = vadd.f32 %v303_v55, %v302_v52  ;;  %v298_v59 = vrot.slane %v297_v54, 2 }
 0x237   :  { %443 = vmatpush.msrb.mxu0 %v410_v53 }
 0x238   :  { %v305_v60 = vrot.slane %v304_v57, 2  ;;  %v299_v61 = vadd.f32 %v298_v59, %v297_v54 }
 0x23a   :  { %v306_v62 = vadd.f32 %v305_v60, %v304_v57  ;;  %v300_v63 = vrot.slane %v299_v61, 1 }
 0x23c   :  { %v301_v0 = vadd.f32 %v300_v63, %v299_v61  ;;  %v307_v1 = vrot.slane %v306_v62, 1  ;;  %v465_v63 = vld [vmem:[#allocation5 + $0x2f0] sm:$0xff] }
 0x23e   :  { %v308_v2 = vadd.f32 %v307_v1, %v306_v62  ;;  %v309_v3 = vmul.f32 0.125, %v301_v0  ;;  %v466_v62 = vld [vmem:[#allocation5 + $0x2f8] sm:$0xff]  ;;  %v464_v1 = vld [vmem:[#allocation5 + $0x2e8] sm:$0xff] }
 0x23f   :  { %469 = vmatpush.msrb.mxu1 %v466_v62 }
 0x240   :  { %v310_v4 = vmul.f32 0.125, %v308_v2  ;;  %v311_v5 = vmul.f32 %v309_v3, %v309_v3  ;;  %v463_v2 = vld [vmem:[#allocation5 + $0x2e0] sm:$0xff] }
 0x241   :  { %470 = vmatpush.msrb.mxu1 %v465_v63 }
 0x242   :  { %v312_v6 = vsub.f32 %v310_v4, %v311_v5  ;;  %v461_v4 = vld [vmem:[#allocation5 + $0x2d0] sm:$0xff] }
 0x243   :  { %471 = vmatpush.msrb.mxu1 %v464_v1 }
 0x244   :  { %v313_v7 = vadd.f32 1e-05, %v312_v6  ;;  %v460_v6 = vld [vmem:[#allocation5 + $0x2c8] sm:$0xff] }
 0x245   :  { %472 = vmatpush.msrb.mxu1 %v463_v2 }
 0x246   :  { %526 = vrsqrt.f32 %v313_v7  ;;  %vm320_vm10 = vweird.f32 %v313_v7 }
 0x24c   :  { %v527_v8 = vpop.eup %526 }
 0x24d   :  { %v315_v9 = vmul.f32 %v527_v8, %v313_v7  ;;  %vm321_vm9 = vweird.f32 %v527_v8 }
 0x24e   :  { %vm322_vm11 = vmor %vm320_vm10, %vm321_vm9 }
 0x24f   :  { %v316_v10 = vmul.f32 %v527_v8, %v315_v9 }
 0x251   :  { %v317_v11 = vmul.f32 0.5, %v316_v10  ;;  %v458_v10 = vld [vmem:[#allocation5 + $0x2b8] sm:$0xff] }
 0x253   :  { %v318_v12 = vsub.f32 1.5, %v317_v11 }
 0x255   :  { %v319_v14 = vmul.f32 %v527_v8, %v318_v12  ;;  %v457_v12 = vld [vmem:[#allocation5 + $0x2b0] sm:$0xff] }
 0x257   :  { %v323_v15 = vsel %vm322_vm11, %v527_v8, %v319_v14  ;;  %v459_v8 = vld [vmem:[#allocation5 + $0x2c0] sm:$0xff]  ;;  %v456_v14 = vld [vmem:[#allocation5 + $0x2a8] sm:$0xff] }
 0x258   :  { %v324_v16 = vmul.f32 %v323_v15, %v294_v13  ;;  %v372_v15 = vld [vmem:[#allocation7 + $0x4] sm:$0x1] }
 0x25a   :  { %v325_v18 = vmul.f32 %v324_v16, %v309_v3  ;;  %v327_v19 = vperm.slane %v324_v16, 0  ;;  %v462_v3 = vld [vmem:[#allocation5 + $0x2d8] sm:$0xff] }
 0x25b   :  { %473 = vmatpush.msrb.mxu1 %v462_v3 }
 0x25c   :  { %v326_v20 = vsub.f32 %v295_v17, %v325_v18  ;;  %v328_v21 = vmul.f32 %v327_v19, %v293_v49  ;;  %v455_v17 = vld [vmem:[#allocation5 + $0x2a0] sm:$0xff] }
 0x25d   :  { %474 = vmatpush.msrb.mxu1 %v461_v4 }
 0x25e   :  { %v329_v22 = vperm.slane %v326_v20, 0  ;;  %v373_v20 = vld [vmem:[#allocation7 + $0x9] sm:$0x1] }
 0x25f   :  { %475 = vmatpush.msrb.mxu1 %v460_v6 }
 0x260   :  { %v330_v23 = vadd.f32 %v329_v22, %v328_v21 }
 0x261   :  { %476 = vmatpush.msrb.mxu1 %v459_v8 }
 0x262   :  { %366 = vmatmul.f32.vlgmr.msra.gmra.mxu3 %v330_v23 }
 0x263   :  { %477 = vmatpush.msrb.mxu1 %v458_v10 }
 0x265   :  { %478 = vmatpush.msrb.mxu1 %v457_v12 }
 0x267   :  { %479 = vmatpush.msrb.mxu1 %v456_v14 }
 0x269   :  { %480 = vmatpush.msrb.mxu1 %v455_v17 }
 0x26b   :  { %481 = vmatpush.msrb.mxu1 %v454_v27 }
 0x26d   :  { %482 = vmatpush.msrb.mxu1 %v453_v28 }
 0x26f   :  { %483 = vmatpush.msrb.mxu1 %v452_v29 }
 0x2e5   :  { %v367_v33 = vpop.f32.mrf.mxu3 }
 0x2e6   :  { %v368_v34 = vadd.f32 %v517_v30, %v367_v33  ;;  %v451_v30 = vld [vmem:[#allocation5 + $0x280] sm:$0xff] }
 0x2e7   :  { %484 = vmatpush.msrb.mxu1 %v451_v30 }
 0x2e8   :  { %v370_v36 = vmul.f32 0.01, %v368_v34 }
 0x2ea   :  { %v667_v38 = vmax.f32 %v368_v34, %v370_v36  ;;  %v519_v36 = vld [vmem:[#allocation7 + $0xf] ss:$0 sm:$0xff] }
 0x2ec   :  { %v374_v40 = vrot.slane %v667_v38, 4  ;;  %v380_v41 = vmul.f32 %v667_v38, %v667_v38 }
 0x2ee   :  { %v375_v43 = vadd.f32 %v374_v40, %v667_v38  ;;  %v381_v44 = vrot.slane %v380_v41, 4 }
 0x2f0   :  { %v376_v46 = vrot.slane %v375_v43, 2  ;;  %v382_v47 = vadd.f32 %v381_v44, %v380_v41 }
 0x2f2   :  { %v377_v49 = vadd.f32 %v376_v46, %v375_v43  ;;  %v383_v50 = vrot.slane %v382_v47, 2 }
 0x2f4   :  { %v384_v52 = vadd.f32 %v383_v50, %v382_v47  ;;  %v378_v54 = vrot.slane %v377_v49, 1 }
 0x2f6   :  { %v385_v55 = vrot.slane %v384_v52, 1  ;;  %v379_v56 = vadd.f32 %v378_v54, %v377_v49 }
 0x2f8   :  { %v386_v57 = vadd.f32 %v385_v55, %v384_v52  ;;  %v387_v58 = vmul.f32 0.125, %v379_v56 }
 0x2fa   :  { %v388_v59 = vmul.f32 0.125, %v386_v57  ;;  %v389_v60 = vmul.f32 %v387_v58, %v387_v58 }
 0x2fc   :  { %v390_v61 = vsub.f32 %v388_v59, %v389_v60 }
 0x2fe   :  { %v391_v0 = vadd.f32 1e-05, %v390_v61 }
 0x300   :  { %528 = vrsqrt.f32 %v391_v0  ;;  %vm398_vm13 = vweird.f32 %v391_v0 }
 0x306   :  { %v529_v5 = vpop.eup %528 }
 0x307   :  { %v393_v7 = vmul.f32 %v529_v5, %v391_v0  ;;  %vm399_vm12 = vweird.f32 %v529_v5 }
 0x308   :  { %vm400_vm14 = vmor %vm398_vm13, %vm399_vm12 }
 0x309   :  { %v394_v9 = vmul.f32 %v529_v5, %v393_v7 }
 0x30b   :  { %v395_v11 = vmul.f32 0.5, %v394_v9 }
 0x30d   :  { %v396_v13 = vsub.f32 1.5, %v395_v11 }
 0x30f   :  { %v397_v16 = vmul.f32 %v529_v5, %v396_v13 }
 0x311   :  { %v401_v18 = vsel %vm400_vm14, %v529_v5, %v397_v16 }
 0x312   :  { %v402_v19 = vmul.f32 %v401_v18, %v372_v15 }
 0x314   :  { %v403_v21 = vmul.f32 %v402_v19, %v387_v58  ;;  %v405_v22 = vperm.slane %v402_v19, 0 }
 0x316   :  { %v404_v23 = vsub.f32 %v373_v20, %v403_v21  ;;  %v406_v24 = vmul.f32 %v405_v22, %v667_v38 }
 0x318   :  { %v407_v25 = vperm.slane %v404_v23, 0 }
 0x31a   :  { %v408_v26 = vadd.f32 %v407_v25, %v406_v24 }
 0x31c   :  { %444 = vmatmul.f32.vlgmr.msrb.gmra.mxu0 %v408_v26 }
 0x399   :  { %v445_v32 = vpop.f32.mrf.mxu0 }
 0x39a   :  { %v446_v33 = vadd.f32 %v518_v31, %v445_v32 }
 0x39c   :  { %v448_v34 = vmul.f32 0.01, %v446_v33 }
 0x39e   :  { %v449_v35 = vmax.f32 %v446_v33, %v448_v34 }
 0x3a0   :  { %485 = vmatmul.f32.vlgmr.msrb.gmra.mxu1 %v449_v35 }
 0x41d   :  { %v486_v37 = vpop.f32.mrf.mxu1 }
 0x41e   :  { %v487_v38 = vadd.f32 %v519_v36, %v486_v37 }
 0x420   :  { %489 = vst [vmem:[#allocation8] sm:$0xff] %v487_v38 }
 0x421   :  { %500 = dma.vmem_to_hbm [thread:$0]  %s496_s2, 128, %s498_s30, [#allocation4]  }
 0x422   :  { %630 = dma.done.wait [#allocation4], 128  }
 0x423   :  { %631 = vsyncadd [#allocation4], 4294967168 }
 0x424   :  { %505 = vsyncpa [#allocation3], 1 }
 0x425   :  { %506 = vsyncpa [#allocation6], 1 }
 0x426   :  { %507 = vsyncpa [#allocation4], 1 }

</bundles_post_ra>
